<compile_context>
chip_gen: v6e
topology: v6e:2x2x1
jax: 0.10.0
libtpu: 0.0.40
codegen_flags: <defaults>
</compile_context>

<pallas_src>
import math
import functools

import jax
import jax.numpy as jnp
from jax.experimental import pallas as pl
from jax.experimental.pallas import tpu as pltpu


# ---------------------------------------------------------------------------
# Kernels (plain jnp bodies -> lower both on real TPU and under interpret mode)
# ---------------------------------------------------------------------------

def _pe_add_kernel(x_ref, pe_ref, o_ref):
    # x_ref / pe_ref / o_ref: identically shaped tiles of the same dtype.
    o_ref[...] = x_ref[...] + pe_ref[...]


def _pe_add_dropout_kernel(x_ref, pe_ref, bits_ref, o_ref, *, threshold, inv_keep):
    # Inverted dropout with an integer-domain keep test:
    #   keep  <=>  bits >= round(p * 2^32)      (P[keep] = 1 - p)
    # and a single fused scale by 1/(1-p) on the kept values.
    y = x_ref[...] + pe_ref[...]
    keep = bits_ref[...] >= jnp.uint32(threshold)
    scale = jnp.asarray(inv_keep, dtype=y.dtype)
    o_ref[...] = jnp.where(keep, y * scale, jnp.zeros_like(y))


# ---------------------------------------------------------------------------
# PE table (same construction as the PyTorch __init__; plain JAX glue)
# ---------------------------------------------------------------------------

def make_sinusoidal_pe(max_len, d_model, dtype=jnp.float32):
    position = jnp.arange(0, max_len, dtype=jnp.float32)[:, None]            # (L, 1)
    div_term = jnp.exp(
        jnp.arange(0, d_model, 2, dtype=jnp.float32)
        * (-(math.log(10000.0) / d_model))
    )                                                                         # (D/2,)
    pe = jnp.zeros((max_len, d_model), jnp.float32)
    pe = pe.at[:, 0::2].set(jnp.sin(position * div_term))
    pe = pe.at[:, 1::2].set(jnp.cos(position * div_term))
    return pe.astype(dtype)


# ---------------------------------------------------------------------------
# Wrapper
# ---------------------------------------------------------------------------

_TILE_VMEM_BUDGET = 32 << 20   # bytes of VMEM devoted to live (double-buffered) tiles
_VMEM_LIMIT_BYTES = 48 << 20   # scoped VMEM limit passed to Mosaic (fits v7x's 64 MiB)
_TILE_ROW_CAP = 2048           # rows per tile upper bound


def _choose_tile_rows(total_rows, row_bytes):
    """Largest sublane-aligned row-tile that fits the double-buffered budget."""
    tm = max(_TILE_VMEM_BUDGET // (2 * row_bytes), 1)
    tm = min(tm, _TILE_ROW_CAP, total_rows)
    if total_rows >= 8:
        tm = max((tm // 8) * 8, 8)      # multiple of 8 sublanes
    else:
        tm = total_rows                 # full-extent block is always legal
    return tm


def positional_encoding(x, pe, *, dropout_p=0.1, training=False, rng_key=None):
    """x: (B, S, D); pe: (max_len, D). Returns dropout(x + pe[:S])."""
    B, S, D = x.shape
    dropout_p = float(dropout_p)
    apply_dropout = bool(training) and dropout_p > 0.0

    if apply_dropout and dropout_p >= 1.0:
        # torch.nn.Dropout(p=1.0) zeroes everything in training mode.
        return jnp.zeros_like(x)

    pe_slice = pe[:S, :].astype(x.dtype)                       # (S, D), pre-cast

    bits = None
    threshold = 0
    inv_keep = 1.0
    if apply_dropout:
        if rng_key is None:
            rng_key = jax.random.PRNGKey(0)
        # TODO(synk): on real TPU hardware, in-kernel pltpu.prng_seed /
        # prng_random_bits would avoid this extra HBM stream, but those
        # primitives do not lower under the CPU interpreter; uniform uint32
        # bits are generated with jax.random and streamed into the kernel.
        bits = jax.random.bits(rng_key, (B, S, D), dtype=jnp.uint32)
        threshold = min(int(round(dropout_p * (1 << 32))), (1 << 32) - 1)
        inv_keep = 1.0 / (1.0 - dropout_p)

    itemsize = jnp.dtype(x.dtype).itemsize
    extra = 4 if apply_dropout else 0   # bytes/row contributed by the bits stream

    if D % 128 == 0:
        # ----- lane-dense already: tile (batch, seq); PE stays (S, D), no bcast.
        row_bytes = D * (3 * itemsize + extra)
        TS = _choose_tile_rows(S, row_bytes)
        grid = (B, pl.cdiv(S, TS))
        x_spec = pl.BlockSpec((None, TS, D), lambda b, s: (b, s, 0))
        pe_spec = pl.BlockSpec((TS, D), lambda b, s: (s, 0))
        out_spec = pl.BlockSpec((None, TS, D), lambda b, s: (b, s, 0))
        out_shape = jax.ShapeDtypeStruct((B, S, D), x.dtype)
        inputs = [x, pe_slice]
        in_specs = [x_spec, pe_spec]
        if apply_dropout:
            inputs.append(bits)
            in_specs.append(pl.BlockSpec((None, TS, D), lambda b, s: (b, s, 0)))
        reshape_back = None
    else:
        # ----- D not a multiple of 128 (e.g. the demo's D=32): flatten to a
        # lane-dense 2-D slab so stores are unmasked.  PE is tiny, so
        # broadcasting it over batch keeps the kernel a pure two-operand add
        # over identically shaped tiles.
        pe_full = jnp.broadcast_to(pe_slice[None, :, :], (B, S, D))
        N = B * S * D
        C = next((c for c in (512, 256, 128) if N % c == 0), D)
        R = N // C
        xf = x.reshape(R, C)
        pef = pe_full.reshape(R, C)
        row_bytes = C * (3 * itemsize + extra)
        TM = _choose_tile_rows(R, row_bytes)
        grid = (pl.cdiv(R, TM),)
        blk = lambda i: (i, 0)
        x_spec = pl.BlockSpec((TM, C), blk)
        pe_spec = pl.BlockSpec((TM, C), blk)
        out_spec = pl.BlockSpec((TM, C), blk)
        out_shape = jax.ShapeDtypeStruct((R, C), x.dtype)
        inputs = [xf, pef]
        in_specs = [x_spec, pe_spec]
        if apply_dropout:
            inputs.append(bits.reshape(R, C))
            in_specs.append(pl.BlockSpec((TM, C), blk))
        reshape_back = (B, S, D)

    if apply_dropout:
        kernel = functools.partial(
            _pe_add_dropout_kernel, threshold=threshold, inv_keep=inv_keep)
    else:
        kernel = _pe_add_kernel

    out = pl.pallas_call(
        kernel,
        out_shape=out_shape,
        grid=grid,
        in_specs=in_specs,
        out_specs=out_spec,
        compiler_params=pltpu.CompilerParams(
            dimension_semantics=("parallel",) * len(grid),
            vmem_limit_bytes=_VMEM_LIMIT_BYTES,
        ),
    )(*inputs)

    if reshape_back is not None:
        out = out.reshape(reshape_back)
    return out


# ---------------------------------------------------------------------------
# Demo / self-check
# ---------------------------------------------------------------------------

if __name__ == "__main__":
    # Small shapes consistent with the module: batch=2, seq=8, d_model=32.
    B, S, D = 2, 8, 32
    MAX_LEN = 64
    DROPOUT_P = 0.1

    key = jax.random.PRNGKey(0)
    kx, kdrop = jax.random.split(key)
    x = jax.random.normal(kx, (B, S, D), dtype=jnp.float32)

    pe = make_sinusoidal_pe(MAX_LEN, D, dtype=jnp.float32)

    # Eval-mode forward (dropout is identity), matching module.eval().
    out = positional_encoding(x, pe, dropout_p=DROPOUT_P, training=False)
    out = jax.block_until_ready(out)

    ref = x + pe[None, :S, :]
    assert out.shape == (B, S, D)
    assert jnp.allclose(out, ref, atol=1e-6), "mismatch vs reference (eval)"

    # Training path: every output element is either 0 (dropped) or
    # (x + pe) / (1 - p) (kept, inverted-dropout scaling).
    out_train = positional_encoding(x, pe, dropout_p=DROPOUT_P,
                                    training=True, rng_key=kdrop)
    out_train = jax.block_until_ready(out_train)
    scaled = ref / (1.0 - DROPOUT_P)
    ok = jnp.logical_or(jnp.isclose(out_train, 0.0, atol=1e-6),
                        jnp.isclose(out_train, scaled, atol=1e-5))
    assert bool(jnp.all(ok)), "mismatch vs reference (train/dropout)"

    print("KERNEL_OK")
</pallas_src>

<mosaic_0001>
module attributes {stable_mosaic.version = 11 : i64} {
  func.func @_pe_add_kernel(%arg0: i32, %arg1: memref<1x512xf32, #tpu.memory_space<vmem>>, %arg2: memref<1x512xf32, #tpu.memory_space<vmem>>, %arg3: memref<1x512xf32, #tpu.memory_space<vmem>>) attributes {dimension_semantics = [#tpu.dimension_semantics<parallel>], iteration_bounds = array<i64: 1>, scalar_prefetch = 0 : i64, scratch_operands = 0 : i64, tpu.core_type = #tpu.core_type<tc>, window_params = [{transform_indices = @transform_0, window_bounds = array<i64: 1, 512>}, {transform_indices = @transform_1, window_bounds = array<i64: 1, 512>}, {transform_indices = @transform_2, window_bounds = array<i64: 1, 512>}]} {
    %c0 = arith.constant 0 : index
    %c0_0 = arith.constant 0 : index
    %0 = vector.load %arg1[%c0, %c0_0] : memref<1x512xf32, #tpu.memory_space<vmem>>, vector<1x512xf32>
    %c0_1 = arith.constant 0 : index
    %c0_2 = arith.constant 0 : index
    %1 = vector.load %arg2[%c0_1, %c0_2] : memref<1x512xf32, #tpu.memory_space<vmem>>, vector<1x512xf32>
    %2 = arith.addf %0, %1 : vector<1x512xf32>
    %c0_3 = arith.constant 0 : index
    %c0_4 = arith.constant 0 : index
    %3 = vector.load %arg3[%c0_3, %c0_4] : memref<1x512xf32, #tpu.memory_space<vmem>>, vector<1x512xf32>
    tpu.vector_store %arg3[%c0_3, %c0_4], %2 {strides = array<i32>} : memref<1x512xf32, #tpu.memory_space<vmem>>, vector<1x512xf32>,
    return
  }
  func.func @transform_0(%arg0: i32) -> (i32, i32) {
    %c0_i32 = arith.constant 0 : i32
    %c0_i32_0 = arith.constant 0 : i32
    return %arg0, %c0_i32 : i32, i32
  }
  func.func @transform_1(%arg0: i32) -> (i32, i32) {
    %c0_i32 = arith.constant 0 : i32
    %c0_i32_0 = arith.constant 0 : i32
    return %arg0, %c0_i32 : i32, i32
  }
  func.func @transform_2(%arg0: i32) -> (i32, i32) {
    %c0_i32 = arith.constant 0 : i32
    %c0_i32_0 = arith.constant 0 : i32
    return %arg0, %c0_i32 : i32, i32
  }
}

</mosaic_0001>

<bundles_post_ra>
// kernel: tpu_custom_call.1
= control target key start
LH: loop header
LB: loop body
LE: loop exit
PB: predicated region body
PF: predicated region fallthrough
CT: control target
= control target key end

     0   :  { %7 = vsyncpa [#allocation3], 0  ;;  %s156_s0 = inlined_call_operand.hbm [shape: f32[1,512], index: 0, kind: input, shape index: {}]   ;;  %s157_s1 = inlined_call_operand.hbm [shape: f32[1,512], index: 1, kind: input, shape index: {}]   ;;  %s158_s2 = inlined_call_operand.hbm [shape: f32[1,512], index: 2, kind: output, shape index: {}]  }
   0x1   :  { %8 = vsyncpa [#allocation6], 0 }
   0x2   :  { %9 = vsyncpa [#allocation4], 0  ;;  %s129_s9 = smov [#allocation2]   ;;  %s130_s11 = smov [#allocation5]  }
   0x3   :  { %s16_s10 = sshll.u32 %s129_s9, 4  ;;  %s26_s12 = sshll.u32 %s130_s11, 4  ;;  %s17_s10 = int_to_ptr.vmem [resolvable:$true] %s16_s10  ;;  %s27_s12 = int_to_ptr.vmem [resolvable:$true] %s26_s12 }
   0x4   :  { %s71_s13 = scalar_lea.vmem %s17_s10, 64  ;;  %p76_p1 = scmp.lt.s32.totalorder %s17_s10, %s17_s10 }
   0x5   :  { %p72_p0 = scmp.ne.s32.totalorder %s17_s10, %s71_s13  ;;  %p77_p2 = scmp.lt.s32.totalorder %s71_s13, %s71_s13 }
   0x7   :  { %p78_p3 = por %p77_p2, %p76_p1 }
   0x9   :  { %p79_p4 = pnand %p78_p3, %p72_p0 }
   0xb   :  { %82 = shalt.err (!%p79_p4)
}
   0xc   :  { %19 = dma.hbm_to_vmem [thread:$0]  %s156_s0, 64, %s17_s10, [#allocation3]  }
   0xd   :  { %s91_s16 = scalar_lea.vmem %s27_s12, 64  ;;  %p96_p6 = scmp.lt.s32.totalorder %s27_s12, %s27_s12 }
   0xe   :  { %p92_p5 = scmp.ne.s32.totalorder %s27_s12, %s91_s16  ;;  %p97_p7 = scmp.lt.s32.totalorder %s91_s16, %s91_s16 }
  0x10   :  { %p98_p8 = por %p97_p7, %p96_p6 }
  0x12   :  { %p99_p9 = pnand %p98_p8, %p92_p5 }
  0x14   :  { %102 = shalt.err (!%p99_p9)
}
  0x15   :  { %29 = dma.hbm_to_vmem [thread:$0]  %s157_s1, 64, %s27_s12, [#allocation6]  }
  0x16   :  { %123 = dma.done.wait [#allocation3], 64  }
  0x17   :  { %124 = vsyncadd [#allocation3], 4294967232 }
  0x18   :  { %125 = dma.done.wait [#allocation6], 64  }
  0x19   :  { %126 = vsyncadd [#allocation6], 4294967232  ;;  %v39_v0 = vlaneseq  ;;  %s131_s19 = smov [#allocation7]   ;;  %v36_v1 = vld [vmem:[#allocation2] sm:$0xf] }
  0x1a   :  { %s50_s20 = sshll.u32 %s131_s19, 4  ;;  %v37_v2 = vld [vmem:[#allocation5] sm:$0xf]  ;;  %s51_s20 = int_to_ptr.vmem [resolvable:$true] %s50_s20 }
  0x1b   :  { %vm41_vm0 = vcmp.lt.s32.totalorder %v39_v0, 512  ;;  %v38_v3 = vadd.f32 %v37_v2, %v36_v1  ;;  %s103_s0 = scalar_lea.vmem %s51_s20, 64  ;;  %p108_p11 = scmp.lt.s32.totalorder %s51_s20, %s51_s20 }
  0x1c   :  { %p104_p10 = scmp.ne.s32.totalorder %s51_s20, %s103_s0  ;;  %p109_p12 = scmp.lt.s32.totalorder %s103_s0, %s103_s0 }
  0x1d   :  { %43 = vst.msk [vmem:[#allocation7] sm:$0xf] %vm41_vm0, %v38_v3 }
  0x1e   :  { %p110_p13 = por %p109_p12, %p108_p11 }
  0x20   :  { %p111_p0 = pnand %p110_p13, %p104_p10 }
  0x22   :  { %114 = shalt.err (!%p111_p0)
}
  0x23   :  { %53 = dma.vmem_to_hbm [thread:$0]  %s51_s20, 64, %s158_s2, [#allocation4]  }
  0x24   :  { %127 = dma.done.wait [#allocation4], 64  }
  0x25   :  { %128 = vsyncadd [#allocation4], 4294967232 }
  0x26   :  { %57 = vsyncpa [#allocation3], 1 }
  0x27   :  { %58 = vsyncpa [#allocation6], 1 }
  0x28   :  { %59 = vsyncpa [#allocation4], 1 }

</bundles_post_ra>
